<compile_context>
chip_gen: v7x
topology: tpu7x:2x2x1
jax: 0.10.0
libtpu: 0.0.40
codegen_flags: <defaults>
</compile_context>

<pallas_src>
import functools

import jax
import jax.numpy as jnp
from jax.experimental import pallas as pl
from jax.experimental.pallas import tpu as pltpu


def _rmsnorm_kernel(x_ref, w_ref, o_ref, *, eps):
    # x_ref: (TR, D) tile, w_ref: (1, D), o_ref: (TR, D)
    x = x_ref[...].astype(jnp.float32)                 # match .to(torch.float32)
    ms = jnp.mean(x * x, axis=-1, keepdims=True)       # mean of squares over d_model
    inv_scale = jax.lax.rsqrt(ms + eps)                # EUP rsqrt: 1/sqrt(ms + eps)
    w = w_ref[...].astype(jnp.float32)
    # Multiply in f32, downcast once (single rounding) to the output dtype.
    o_ref[...] = (x * inv_scale * w).astype(o_ref.dtype)


def _tpu_generation_info():
    """Returns (vmem_capacity_bytes, num_tensorcores_heuristic)."""
    try:
        vmem = int(pltpu.get_tpu_info().vmem_capacity_bytes)
    except Exception:
        vmem = 64 * 1024 * 1024  # conservative (v7x-sized)
    # 128 MiB-VMEM parts (v5e/v6e) are single-TC; 64 MiB parts (v7x) are dual-TC.
    num_cores = 1 if vmem >= 100 * 1024 * 1024 else 2
    return vmem, num_cores


def _pick_row_tile(rows, d_model, in_itemsize, out_itemsize, *,
                   vmem_budget, num_cores, sublane):
    """Row tile (multiple of the dtype-native sublane) whose double-buffered
    in/out tiles plus f32 temporaries fit the budget, targeting a few MiB of
    data movement per grid step and >= 2 steps per TensorCore on v7x."""
    # 2x-buffered input + 2x-buffered output + ~2 f32 temporaries per element.
    per_row = d_model * (2 * in_itemsize + 2 * out_itemsize + 8)
    budget_tile = max(sublane, vmem_budget // max(per_row, 1))
    # Keep each step moving ~4-8 MiB of input, but cap code/DMA size.
    row_in_bytes = max(d_model * in_itemsize, 1)
    byte_cap = max(1024, (8 * 1024 * 1024) // row_in_bytes)
    tile = min(budget_tile, byte_cap, 16384)
    tile = max(sublane, (tile // sublane) * sublane)
    # No point tiling larger than the (sublane-padded) number of rows.
    tile = min(tile, -(-rows // sublane) * sublane)

    # Dual-core parts: aim for >= 2 grid steps per TensorCore so the output
    # DMA of step i overlaps the input DMA of step i+1 on each core.
    min_steps = 2 * num_cores
    natural_steps = -(-rows // tile)
    if num_cores > 1 and natural_steps < min_steps and rows > min_steps * sublane:
        split = max(sublane, (rows // min_steps) // sublane * sublane)
        tile = min(tile, split)
    return tile


def rmsnorm(x, w, eps=1e-5, *, row_tile=None):
    """x: (batch, pos, d_model); w: (d_model,). Matches transformer_lens RMSNorm."""
    B, P, D = x.shape
    rows = B * P
    x2d = x.reshape(rows, D)
    w2d = w.reshape(1, D)
    out_dtype = x.dtype

    vmem_capacity, num_cores = _tpu_generation_info()
    if vmem_capacity >= 100 * 1024 * 1024:      # v5e / v6e: 128 MiB VMEM, 1 TC
        vmem_budget = 64 * 1024 * 1024
        vmem_cap = 96 * 1024 * 1024
    else:                                       # v7x: 64 MiB VMEM per TC, 2 TCs
        vmem_budget = 24 * 1024 * 1024
        vmem_cap = 48 * 1024 * 1024

    # Dtype-native sublane multiple: 8 for 4-byte, 16 for 2-byte, 32 for 1-byte.
    sublane = max(8, 32 // max(x.dtype.itemsize, 1))

    if row_tile is None:
        row_tile = _pick_row_tile(rows, D, x.dtype.itemsize, out_dtype.itemsize,
                                  vmem_budget=vmem_budget, num_cores=num_cores,
                                  sublane=sublane)

    grid = (pl.cdiv(rows, row_tile),)  # ragged last block handled by Pallas masking

    tile_in = row_tile * D * x.dtype.itemsize
    tile_out = row_tile * D * out_dtype.itemsize
    tile_tmp = row_tile * D * 8                 # f32 temporaries inside the kernel
    vmem_limit = int(min(vmem_cap,
                         max(8 * 1024 * 1024,
                             2 * tile_in + 2 * tile_out + tile_tmp
                             + D * 4 + (2 << 20))))

    out2d = pl.pallas_call(
        functools.partial(_rmsnorm_kernel, eps=eps),
        out_shape=jax.ShapeDtypeStruct((rows, D), out_dtype),
        grid_spec=pltpu.PrefetchScalarGridSpec(
            num_scalar_prefetch=0,
            grid=grid,
            in_specs=[
                pl.BlockSpec((row_tile, D), lambda i: (i, 0)),
                # Block == full array (1, D) -> w stays VMEM-resident across the grid.
                pl.BlockSpec((1, D), lambda i: (0, 0)),
            ],
            out_specs=pl.BlockSpec((row_tile, D), lambda i: (i, 0)),
        ),
        compiler_params=pltpu.CompilerParams(
            dimension_semantics=("parallel",),
            vmem_limit_bytes=vmem_limit,
        ),
    )(x2d, w2d)

    return out2d.reshape(B, P, D)


def rmsnorm_ref(x, w, eps=1e-5):
    xf = x.astype(jnp.float32)
    scale = jnp.sqrt(jnp.mean(xf * xf, axis=-1, keepdims=True) + eps)
    return ((xf / scale).astype(x.dtype).astype(jnp.float32)
            * w.astype(jnp.float32)).astype(x.dtype)


if __name__ == "__main__":
    key = jax.random.PRNGKey(0)
    batch, pos, d_model = 2, 8, 128
    eps = 1e-5

    x = jax.random.normal(key, (batch, pos, d_model), dtype=jnp.float32)
    # Parameter init: nn.Parameter(torch.ones(length)) -> ones, deterministic.
    w = jnp.ones((d_model,), dtype=jnp.float32)

    out = jax.block_until_ready(rmsnorm(x, w, eps))
    ref = rmsnorm_ref(x, w, eps)
    assert out.shape == (batch, pos, d_model)
    assert out.dtype == x.dtype
    assert jnp.allclose(out, ref, atol=1e-4, rtol=1e-4)

    # Awkward shape exercising the ragged last block (rows % row_tile != 0).
    x2 = jax.random.normal(jax.random.PRNGKey(1), (3, 5, d_model), dtype=jnp.float32)
    out2 = jax.block_until_ready(rmsnorm(x2, w, eps))
    assert out2.shape == (3, 5, d_model)
    assert jnp.allclose(out2, rmsnorm_ref(x2, w, eps), atol=1e-4, rtol=1e-4)

    # bf16 activations + bf16 weights (cfg.dtype=bfloat16 path).
    xb = jax.random.normal(jax.random.PRNGKey(2), (2, 7, d_model),
                           dtype=jnp.bfloat16)
    wb = jnp.ones((d_model,), dtype=jnp.bfloat16)
    outb = jax.block_until_ready(rmsnorm(xb, wb, eps))
    assert outb.shape == (2, 7, d_model)
    assert outb.dtype == jnp.bfloat16
    assert jnp.allclose(outb.astype(jnp.float32),
                        rmsnorm_ref(xb, wb, eps).astype(jnp.float32),
                        atol=2e-2, rtol=2e-2)

    print("KERNEL_OK")
</pallas_src>

<mosaic_0001>
module attributes {stable_mosaic.version = 11 : i64} {
  func.func @_rmsnorm_kernel(%arg0: i32, %arg1: memref<16x128xf32, #tpu.memory_space<vmem>>, %arg2: memref<1x128xf32, #tpu.memory_space<vmem>>, %arg3: memref<16x128xf32, #tpu.memory_space<vmem>>) attributes {dimension_semantics = [#tpu.dimension_semantics<parallel>], iteration_bounds = array<i64: 1>, scalar_prefetch = 0 : i64, scratch_operands = 0 : i64, tpu.core_type = #tpu.core_type<tc>, window_params = [{transform_indices = @transform_0, window_bounds = array<i64: 16, 128>}, {pipeline_mode = #tpu.pipeline_mode<synchronous>, transform_indices = @transform_1, window_bounds = array<i64: 1, 128>}, {transform_indices = @transform_2, window_bounds = array<i64: 16, 128>}]} {
    %c0 = arith.constant 0 : index
    %c0_0 = arith.constant 0 : index
    %0 = vector.load %arg1[%c0, %c0_0] : memref<16x128xf32, #tpu.memory_space<vmem>>, vector<16x128xf32>
    %1 = arith.mulf %0, %0 : vector<16x128xf32>
    %cst = arith.constant dense<0.000000e+00> : vector<16xf32>
    %2 = vector.multi_reduction <add>, %1, %cst [1] : vector<16x128xf32> to vector<16xf32>
    %3 = vector.shape_cast %2 : vector<16xf32> to vector<16x1xf32>
    %cst_1 = arith.constant 1.280000e+02 : f32
    %4 = vector.broadcast %cst_1 : f32 to vector<16x1xf32>
    %5 = arith.divf %3, %4 : vector<16x1xf32>
    %cst_2 = arith.constant 9.99999974E-6 : f32
    %6 = vector.broadcast %cst_2 : f32 to vector<16x1xf32>
    %7 = arith.addf %5, %6 : vector<16x1xf32>
    %8 = math.rsqrt %7 : vector<16x1xf32>
    %c0_3 = arith.constant 0 : index
    %c0_4 = arith.constant 0 : index
    %9 = vector.load %arg2[%c0_3, %c0_4] : memref<1x128xf32, #tpu.memory_space<vmem>>, vector<1x128xf32>
    %10 = vector.broadcast %8 : vector<16x1xf32> to vector<16x128xf32>
    %11 = arith.mulf %0, %10 : vector<16x128xf32>
    %12 = vector.broadcast %9 : vector<1x128xf32> to vector<16x128xf32>
    %13 = arith.mulf %11, %12 : vector<16x128xf32>
    %c0_5 = arith.constant 0 : index
    %c0_6 = arith.constant 0 : index
    %14 = vector.load %arg3[%c0_5, %c0_6] : memref<16x128xf32, #tpu.memory_space<vmem>>, vector<16x128xf32>
    tpu.vector_store %arg3[%c0_5, %c0_6], %13 {strides = array<i32>} : memref<16x128xf32, #tpu.memory_space<vmem>>, vector<16x128xf32>,
    return
  }
  func.func @transform_0(%arg0: i32) -> (i32, i32) {
    %c0_i32 = arith.constant 0 : i32
    %c0_i32_0 = arith.constant 0 : i32
    return %arg0, %c0_i32 : i32, i32
  }
  func.func @transform_1(%arg0: i32) -> (i32, i32) {
    %c0_i32 = arith.constant 0 : i32
    %c0_i32_0 = arith.constant 0 : i32
    %c0_i32_1 = arith.constant 0 : i32
    return %c0_i32, %c0_i32_0 : i32, i32
  }
  func.func @transform_2(%arg0: i32) -> (i32, i32) {
    %c0_i32 = arith.constant 0 : i32
    %c0_i32_0 = arith.constant 0 : i32
    return %arg0, %c0_i32 : i32, i32
  }
}

</mosaic_0001>

<bundles_post_ra>
// kernel: tpu_custom_call.1
= control target key start
LH: loop header
LB: loop body
LE: loop exit
PB: predicated region body
PF: predicated region fallthrough
CT: control target
= control target key end

     0   :  { %7 = vsyncpa [#allocation3], 0  ;;  %s180_s0 = inlined_call_operand.hbm [shape: f32[16,128], index: 0, kind: input, shape index: {}]   ;;  %s181_s1 = inlined_call_operand.vmem [shape: f32[1,128], index: 1, kind: input, shape index: {}]   ;;  %s182_s2 = inlined_call_operand.hbm [shape: f32[16,128], index: 2, kind: output, shape index: {}]  }
   0x1   :  { %8 = vsyncpa [#allocation4], 0  ;;  %s128_s9 = smov [#allocation2]   ;;  %s80_s13 = scalar_lea.hbm %s180_s0, 256 }
   0x2   :  { %s14_s10 = sshll.u32 %s128_s9, 4  ;;  %p81_p0 = scmp.ne.s32.totalorder %s180_s0, %s80_s13  ;;  %s15_s10 = int_to_ptr.vmem [resolvable:$true] %s14_s10 }
   0x3   :  { %p84_p1 = scmp.lt.u32.totalorder %s80_s13, %s180_s0 }
   0x5   :  { %p86_p2 = pnand %p84_p1, %p81_p0 }
   0x7   :  { %89 = shalt.err (!%p86_p2)
}
   0x8   :  { %s90_s18 = scalar_lea.vmem %s15_s10, 256  ;;  %p95_p4 = scmp.lt.s32.totalorder %s15_s10, %s15_s10 }
   0x9   :  { %p91_p3 = scmp.ne.s32.totalorder %s15_s10, %s90_s18  ;;  %p96_p5 = scmp.lt.s32.totalorder %s90_s18, %s90_s18 }
   0xb   :  { %p97_p6 = por %p96_p5, %p95_p4 }
   0xd   :  { %p98_p7 = pnand %p97_p6, %p91_p3 }
   0xf   :  { %101 = shalt.err (!%p98_p7)
}
  0x10   :  { %s129_s19 = smov 128   ;;  %s130_s20 = smov 8  }
  0x11   :  { %20 = dma.hbm_to_vmem [thread:$0]  %s180_s0, 256, %s15_s10, [#allocation3], %s129_s19, %s129_s19, %s130_s20  }
  0x12   :  { %124 = dma.done.wait [#allocation3], 256  }
  0x13   :  { %125 = vsyncadd [#allocation3], 4294967040  ;;  %v26_v0 = vld [vmem:[#allocation2] sm:$0xff]  ;;  %v27_v1 = vld [vmem:[#allocation2 + $0x8] sm:$0xff]  ;;  %s131_s0 = smov [#allocation5]  }
  0x14   :  { %v28_v2 = vmul.f32 %v26_v0, %v26_v0  ;;  %v29_v3 = vmul.f32 %v27_v1, %v27_v1  ;;  %v71_v11 = vld [vmem:[%s181_s1] ss:$0 sm:$0xff]  ;;  %s59_s25 = sshll.u32 %s131_s0, 4  ;;  %s60_s25 = int_to_ptr.vmem [resolvable:$true] %s59_s25 }
  0x15   :  { %s102_s26 = scalar_lea.vmem %s60_s25, 256  ;;  %p107_p9 = scmp.lt.s32.totalorder %s60_s25, %s60_s25 }
  0x16   :  { %30 = vadd.xlane.f32.xlu0 %v28_v2  ;;  %p103_p8 = scmp.ne.s32.totalorder %s60_s25, %s102_s26  ;;  %p108_p10 = scmp.lt.s32.totalorder %s102_s26, %s102_s26 }
  0x18   :  { %p109_p11 = por %p108_p10, %p107_p9 }
  0x1a   :  { %32 = vadd.xlane.f32.xlu0 %v29_v3  ;;  %p110_p12 = pnand %p109_p11, %p103_p8 }
  0xa3   :  { %v31_v4 = vpop.xlane.xlu0 %30 }
  0xa4   :  { %v35_v5 = vmul.f32 0.0078125, %v31_v4 }
  0xa6   :  { %v37_v6 = vadd.f32 1e-05, %v35_v5 }
  0xa7   :  { %v33_v7 = vpop.xlane.xlu0 %32 }
  0xa8   :  { %76 = vrsqrt.f32 %v37_v6  ;;  %v36_v8 = vmul.f32 0.0078125, %v33_v7 }
  0xaa   :  { %v38_v9 = vadd.f32 1e-05, %v36_v8 }
  0xac   :  { %78 = vrsqrt.f32 %v38_v9 }
  0xb2   :  { %v77_v10 = vpop.eup %76 }
  0xb3   :  { %v42_v12 = vmul.f32 %v77_v10, %v26_v0 }
  0xb5   :  { %v50_v13 = vmul.f32 %v71_v11, %v42_v12 }
  0xb6   :  { %v79_v14 = vpop.eup %78 }
  0xb7   :  { %v43_v15 = vmul.f32 %v79_v14, %v27_v1  ;;  %52 = vst [vmem:[#allocation5] sm:$0xff] %v50_v13 }
  0xb9   :  { %v51_v16 = vmul.f32 %v71_v11, %v43_v15 }
  0xbb   :  { %53 = vst [vmem:[#allocation5 + $0x8] sm:$0xff] %v51_v16 }
  0xbc   :  { %113 = shalt.err (!%p110_p12)
}
  0xbd   :  { %s114_s1 = scalar_lea.hbm %s182_s2, 256 }
  0xbe   :  { %p115_p13 = scmp.ne.s32.totalorder %s182_s2, %s114_s1  ;;  %p118_p0 = scmp.lt.u32.totalorder %s114_s1, %s182_s2 }
  0xc0   :  { %p120_p1 = pnand %p118_p0, %p115_p13 }
  0xc2   :  { %123 = shalt.err (!%p120_p1)
}
  0xc3   :  { %65 = dma.vmem_to_hbm [thread:$0]  %s60_s25, 256, %s182_s2, [#allocation4], %s129_s19, %s129_s19, %s130_s20  }
  0xc4   :  { %126 = dma.done.wait [#allocation4], 256  }
  0xc5   :  { %127 = vsyncadd [#allocation4], 4294967040 }
  0xc6   :  { %69 = vsyncpa [#allocation3], 1 }
  0xc7   :  { %70 = vsyncpa [#allocation4], 1 }

</bundles_post_ra>
